<compile_context>
chip_gen: v7x
topology: tpu7x:2x2x1
jax: 0.10.0
libtpu: 0.0.40
codegen_flags: <defaults>
</compile_context>

<pallas_src>
import functools

import jax
import jax.numpy as jnp
from jax.experimental import pallas as pl
from jax.experimental.pallas import tpu as pltpu

_NUM_CORES = 2  # leading "parallel" grid axis (megacore on v7x, harmless elsewhere)


def _round_up(x, m):
    return (x + m - 1) // m * m


def _lgamma(x):
    """lgamma(x) for x >= 1 using recurrence shift + Stirling series.

    lgamma(x) = lgamma(x + 8) - log(x (x+1) ... (x+7)); Stirling at z = x + 8 >= 9.
    The shift product is split into two 4-term products (two logs) to avoid f32
    overflow for large counts.  Only 3 logs + 1 approx reciprocal per element.
    """
    p0 = x * (x + 1.0) * (x + 2.0) * (x + 3.0)
    p1 = (x + 4.0) * (x + 5.0) * (x + 6.0) * (x + 7.0)
    shift = jnp.log(p0) + jnp.log(p1)

    z = x + 8.0
    log_z = jnp.log(z)
    zinv = pl.reciprocal(z, approx=True)     # feeds only the small correction series
    zinv2 = zinv * zinv
    series = zinv * (1.0 / 12.0 + zinv2 * (-1.0 / 360.0
                     + zinv2 * (1.0 / 1260.0 + zinv2 * (-1.0 / 1680.0))))
    half_log_2pi = 0.9189385332046727
    return (z - 0.5) * log_z - z + half_log_2pi + series - shift


def mnll_kernel(logits_ref, counts_ref, out_ref, acc_ref, *, n_rows, row_tile):
    c = pl.program_id(0)          # core-parallel axis
    i = pl.program_id(1)          # row-block (reduction) axis
    steps = pl.num_programs(1)

    @pl.when(i == 0)
    def _():
        acc_ref[...] = jnp.zeros_like(acc_ref)

    x = logits_ref[...].astype(jnp.float32)                       # (TM, L)
    cnt = jnp.maximum(counts_ref[...].astype(jnp.float32), 1e-8)  # clamp(min=1e-8)

    # log_softmax along the last (lane) axis, max-subtracted for stability.
    m = jnp.max(x, axis=-1, keepdims=True)
    lse = jnp.log(jnp.sum(jnp.exp(x - m), axis=-1, keepdims=True)) + m
    log_probs = x - lse

    ll = jnp.sum(cnt * log_probs, axis=-1, keepdims=True)         # (TM, 1)
    total = jnp.sum(cnt, axis=-1, keepdims=True)                  # (TM, 1)
    ll = ll + _lgamma(total + 1.0) - jnp.sum(_lgamma(cnt + 1.0), axis=-1, keepdims=True)

    # Mask padded rows (global row index >= n_rows contributes nothing).
    row0 = (c * steps + i) * row_tile
    rows = row0 + jax.lax.broadcasted_iota(jnp.int32, (row_tile, 1), 0)
    ll = jnp.where(rows < n_rows, ll, 0.0)

    # Cheap VPU accumulation per step; single XLU reduce + scalar store at the end.
    acc_ref[...] += ll

    @pl.when(i == steps - 1)
    def _():
        out_ref[...] = jnp.sum(acc_ref[...]).reshape(1, 1, 1)


def multinomial_nll_loss(logits, true_counts, *, row_tile=512):
    """Pallas implementation of MultinomialNLLLoss.forward."""
    assert logits.shape == true_counts.shape
    L = logits.shape[-1]
    N = 1
    for d in logits.shape[:-1]:
        N *= d

    # Keep native dtypes (bf16 halves DMA bytes); f32 cast happens in-kernel.
    logits2 = logits.reshape(N, L)
    counts2 = true_counts.reshape(N, L)

    itemsize = max(jnp.dtype(logits2.dtype).itemsize, jnp.dtype(counts2.dtype).itemsize)
    # Cap each streamed input block at ~2 MiB so double-buffered blocks comfortably fit
    # the 32 MiB default scoped VMEM even on v7x (64 MiB physical).
    vmem_cap_rows = max(8, (2 * 1024 * 1024) // (L * itemsize) // 8 * 8)
    tile = min(row_tile, vmem_cap_rows, _round_up(pl.cdiv(N, _NUM_CORES), 8))
    tile = max(8, tile // 8 * 8)

    steps = pl.cdiv(N, _NUM_CORES * tile)
    padded_n = _NUM_CORES * steps * tile
    if padded_n != N:
        pad = padded_n - N
        logits2 = jnp.pad(logits2, ((0, pad), (0, 0)))
        counts2 = jnp.pad(counts2, ((0, pad), (0, 0)))

    kernel = functools.partial(mnll_kernel, n_rows=N, row_tile=tile)
    in_map = lambda c, i: (c * steps + i, 0)

    partials = pl.pallas_call(
        kernel,
        out_shape=jax.ShapeDtypeStruct((_NUM_CORES, 1, 1), jnp.float32),
        grid_spec=pltpu.PrefetchScalarGridSpec(
            num_scalar_prefetch=0,
            grid=(_NUM_CORES, steps),
            in_specs=[
                pl.BlockSpec((tile, L), in_map),
                pl.BlockSpec((tile, L), in_map),
            ],
            out_specs=pl.BlockSpec((1, 1, 1), lambda c, i: (c, 0, 0)),
            scratch_shapes=[pltpu.VMEM((tile, 1), jnp.float32)],
        ),
        compiler_params=pltpu.CompilerParams(
            dimension_semantics=("parallel", "arbitrary"),
        ),
    )(logits2, counts2)

    return -(jnp.sum(partials) / jnp.float32(N))


def _reference_loss(logits, true_counts):
    """Pure-JAX reference matching the PyTorch module."""
    c = jnp.maximum(true_counts.astype(jnp.float32), 1e-8)
    log_probs = jax.nn.log_softmax(logits.astype(jnp.float32), axis=-1)
    ll = jnp.sum(c * log_probs, axis=-1)
    total = jnp.sum(c, axis=-1)
    ll = ll + jax.scipy.special.gammaln(total + 1.0) \
            - jnp.sum(jax.scipy.special.gammaln(c + 1.0), axis=-1)
    return -jnp.mean(ll)


def _check(logits, counts, tag):
    loss = jax.block_until_ready(multinomial_nll_loss(logits, counts))
    ref = jax.block_until_ready(_reference_loss(logits, counts))
    rel_err = jnp.abs(loss - ref) / (jnp.abs(ref) + 1e-6)
    assert rel_err < 2e-4, f"{tag} mismatch: pallas={loss}, ref={ref}, rel_err={rel_err}"


if __name__ == "__main__":
    key = jax.random.PRNGKey(0)
    k1, k2, k3, k4, k5, k6 = jax.random.split(key, 6)

    # Primary case: (B, T, L) = (2, 8, 256) -> 16 rows of 256 classes.
    B, T, L = 2, 8, 256
    logits = jax.random.normal(k1, (B, T, L), dtype=jnp.float32)
    counts = jax.random.uniform(k2, (B, T, L), dtype=jnp.float32, minval=0.0, maxval=5.0)
    zero_mask = jax.random.bernoulli(k3, 0.2, (B, T, L))
    counts = jnp.where(zero_mask, 0.0, counts)
    _check(logits, counts, "case1")

    # Second case exercises the row-padding / masking path (39 rows, L=384).
    B2, T2, L2 = 3, 13, 384
    logits2 = jax.random.normal(k4, (B2, T2, L2), dtype=jnp.float32)
    counts2 = jax.random.uniform(k5, (B2, T2, L2), dtype=jnp.float32, minval=0.0, maxval=3.0)
    zero_mask2 = jax.random.bernoulli(k6, 0.3, (B2, T2, L2))
    counts2 = jnp.where(zero_mask2, 0.0, counts2)
    _check(logits2, counts2, "case2")

    print("KERNEL_OK")
</pallas_src>

<mosaic_0001>
module attributes {stable_mosaic.version = 11 : i64} {
  func.func @mnll_kernel(%arg0: i32, %arg1: i32, %arg2: memref<8x256xf32, #tpu.memory_space<vmem>>, %arg3: memref<8x256xf32, #tpu.memory_space<vmem>>, %arg4: memref<1x1x1xf32, #tpu.memory_space<vmem>>, %arg5: memref<8x1xf32, #tpu.memory_space<vmem>>) attributes {dimension_semantics = [#tpu.dimension_semantics<parallel>, #tpu.dimension_semantics<arbitrary>], iteration_bounds = array<i64: 2, 1>, scalar_prefetch = 0 : i64, scratch_operands = 1 : i64, tpu.core_type = #tpu.core_type<tc>, window_params = [{transform_indices = @transform_0, window_bounds = array<i64: 8, 256>}, {transform_indices = @transform_1, window_bounds = array<i64: 8, 256>}, {transform_indices = @transform_2, window_bounds = array<i64: 1, 1, 1>}]} {
    %c0_i32 = arith.constant 0 : i32
    %0 = arith.cmpi eq, %arg1, %c0_i32 : i32
    %1 = arith.extui %0 : i1 to i32
    %c0_i32_0 = arith.constant 0 : i32
    %2 = arith.cmpi ne, %1, %c0_i32_0 : i32
    scf.if %2 {
      %cst_46 = arith.constant 0.000000e+00 : f32
      %141 = vector.broadcast %cst_46 : f32 to vector<8x1xf32>
      %c0_47 = arith.constant 0 : index
      %c0_48 = arith.constant 0 : index
      %142 = vector.load %arg5[%c0_47, %c0_48] : memref<8x1xf32, #tpu.memory_space<vmem>>, vector<8x1xf32>
      tpu.vector_store %arg5[%c0_47, %c0_48], %141 {strides = array<i32>} : memref<8x1xf32, #tpu.memory_space<vmem>>, vector<8x1xf32>,
    } else {
    }
    %c0 = arith.constant 0 : index
    %c0_1 = arith.constant 0 : index
    %3 = vector.load %arg2[%c0, %c0_1] : memref<8x256xf32, #tpu.memory_space<vmem>>, vector<8x256xf32>
    %c0_2 = arith.constant 0 : index
    %c0_3 = arith.constant 0 : index
    %4 = vector.load %arg3[%c0_2, %c0_3] : memref<8x256xf32, #tpu.memory_space<vmem>>, vector<8x256xf32>
    %cst = arith.constant 9.99999993E-9 : f32
    %5 = vector.broadcast %cst : f32 to vector<8x256xf32>
    %6 = arith.maximumf %4, %5 : vector<8x256xf32>
    %cst_4 = arith.constant dense<0xFF800000> : vector<8xf32>
    %7 = vector.multi_reduction <maximumf>, %3, %cst_4 [1] : vector<8x256xf32> to vector<8xf32>
    %8 = vector.shape_cast %7 : vector<8xf32> to vector<8x1xf32>
    %9 = vector.broadcast %8 : vector<8x1xf32> to vector<8x256xf32>
    %10 = arith.subf %3, %9 : vector<8x256xf32>
    %11 = math.exp %10 : vector<8x256xf32>
    %cst_5 = arith.constant dense<0.000000e+00> : vector<8xf32>
    %12 = vector.multi_reduction <add>, %11, %cst_5 [1] : vector<8x256xf32> to vector<8xf32>
    %13 = vector.shape_cast %12 : vector<8xf32> to vector<8x1xf32>
    %14 = math.log %13 : vector<8x1xf32>
    %15 = arith.addf %14, %8 : vector<8x1xf32>
    %16 = vector.broadcast %15 : vector<8x1xf32> to vector<8x256xf32>
    %17 = arith.subf %3, %16 : vector<8x256xf32>
    %18 = arith.mulf %6, %17 : vector<8x256xf32>
    %cst_6 = arith.constant dense<0.000000e+00> : vector<8xf32>
    %19 = vector.multi_reduction <add>, %18, %cst_6 [1] : vector<8x256xf32> to vector<8xf32>
    %20 = vector.shape_cast %19 : vector<8xf32> to vector<8x1xf32>
    %cst_7 = arith.constant dense<0.000000e+00> : vector<8xf32>
    %21 = vector.multi_reduction <add>, %6, %cst_7 [1] : vector<8x256xf32> to vector<8xf32>
    %22 = vector.shape_cast %21 : vector<8xf32> to vector<8x1xf32>
    %cst_8 = arith.constant 1.000000e+00 : f32
    %23 = vector.broadcast %cst_8 : f32 to vector<8x1xf32>
    %24 = arith.addf %22, %23 : vector<8x1xf32>
    %cst_9 = arith.constant 1.000000e+00 : f32
    %25 = vector.broadcast %cst_9 : f32 to vector<8x1xf32>
    %26 = arith.addf %24, %25 : vector<8x1xf32>
    %27 = arith.mulf %24, %26 : vector<8x1xf32>
    %cst_10 = arith.constant 2.000000e+00 : f32
    %28 = vector.broadcast %cst_10 : f32 to vector<8x1xf32>
    %29 = arith.addf %24, %28 : vector<8x1xf32>
    %30 = arith.mulf %27, %29 : vector<8x1xf32>
    %cst_11 = arith.constant 3.000000e+00 : f32
    %31 = vector.broadcast %cst_11 : f32 to vector<8x1xf32>
    %32 = arith.addf %24, %31 : vector<8x1xf32>
    %33 = arith.mulf %30, %32 : vector<8x1xf32>
    %cst_12 = arith.constant 4.000000e+00 : f32
    %34 = vector.broadcast %cst_12 : f32 to vector<8x1xf32>
    %35 = arith.addf %24, %34 : vector<8x1xf32>
    %cst_13 = arith.constant 5.000000e+00 : f32
    %36 = vector.broadcast %cst_13 : f32 to vector<8x1xf32>
    %37 = arith.addf %24, %36 : vector<8x1xf32>
    %38 = arith.mulf %35, %37 : vector<8x1xf32>
    %cst_14 = arith.constant 6.000000e+00 : f32
    %39 = vector.broadcast %cst_14 : f32 to vector<8x1xf32>
    %40 = arith.addf %24, %39 : vector<8x1xf32>
    %41 = arith.mulf %38, %40 : vector<8x1xf32>
    %cst_15 = arith.constant 7.000000e+00 : f32
    %42 = vector.broadcast %cst_15 : f32 to vector<8x1xf32>
    %43 = arith.addf %24, %42 : vector<8x1xf32>
    %44 = arith.mulf %41, %43 : vector<8x1xf32>
    %45 = math.log %33 : vector<8x1xf32>
    %46 = math.log %44 : vector<8x1xf32>
    %47 = arith.addf %45, %46 : vector<8x1xf32>
    %cst_16 = arith.constant 8.000000e+00 : f32
    %48 = vector.broadcast %cst_16 : f32 to vector<8x1xf32>
    %49 = arith.addf %24, %48 : vector<8x1xf32>
    %50 = math.log %49 : vector<8x1xf32>
    %51 = tpu.reciprocal %49 {approx = true} : vector<8x1xf32> -> vector<8x1xf32>
    %52 = arith.mulf %51, %51 : vector<8x1xf32>
    %cst_17 = arith.constant -5.95238118E-4 : f32
    %53 = vector.broadcast %cst_17 : f32 to vector<8x1xf32>
    %54 = arith.mulf %52, %53 : vector<8x1xf32>
    %cst_18 = arith.constant 7.93650805E-4 : f32
    %55 = vector.broadcast %cst_18 : f32 to vector<8x1xf32>
    %56 = arith.addf %55, %54 : vector<8x1xf32>
    %57 = arith.mulf %52, %56 : vector<8x1xf32>
    %cst_19 = arith.constant -0.00277777785 : f32
    %58 = vector.broadcast %cst_19 : f32 to vector<8x1xf32>
    %59 = arith.addf %58, %57 : vector<8x1xf32>
    %60 = arith.mulf %52, %59 : vector<8x1xf32>
    %cst_20 = arith.constant 0.0833333358 : f32
    %61 = vector.broadcast %cst_20 : f32 to vector<8x1xf32>
    %62 = arith.addf %61, %60 : vector<8x1xf32>
    %63 = arith.mulf %51, %62 : vector<8x1xf32>
    %cst_21 = arith.constant 5.000000e-01 : f32
    %64 = vector.broadcast %cst_21 : f32 to vector<8x1xf32>
    %65 = arith.subf %49, %64 : vector<8x1xf32>
    %66 = arith.mulf %65, %50 : vector<8x1xf32>
    %67 = arith.subf %66, %49 : vector<8x1xf32>
    %cst_22 = arith.constant 0.918938517 : f32
    %68 = vector.broadcast %cst_22 : f32 to vector<8x1xf32>
    %69 = arith.addf %67, %68 : vector<8x1xf32>
    %70 = arith.addf %69, %63 : vector<8x1xf32>
    %71 = arith.subf %70, %47 : vector<8x1xf32>
    %72 = arith.addf %20, %71 : vector<8x1xf32>
    %cst_23 = arith.constant 1.000000e+00 : f32
    %73 = vector.broadcast %cst_23 : f32 to vector<8x256xf32>
    %74 = arith.addf %6, %73 : vector<8x256xf32>
    %cst_24 = arith.constant 1.000000e+00 : f32
    %75 = vector.broadcast %cst_24 : f32 to vector<8x256xf32>
    %76 = arith.addf %74, %75 : vector<8x256xf32>
    %77 = arith.mulf %74, %76 : vector<8x256xf32>
    %cst_25 = arith.constant 2.000000e+00 : f32
    %78 = vector.broadcast %cst_25 : f32 to vector<8x256xf32>
    %79 = arith.addf %74, %78 : vector<8x256xf32>
    %80 = arith.mulf %77, %79 : vector<8x256xf32>
    %cst_26 = arith.constant 3.000000e+00 : f32
    %81 = vector.broadcast %cst_26 : f32 to vector<8x256xf32>
    %82 = arith.addf %74, %81 : vector<8x256xf32>
    %83 = arith.mulf %80, %82 : vector<8x256xf32>
    %cst_27 = arith.constant 4.000000e+00 : f32
    %84 = vector.broadcast %cst_27 : f32 to vector<8x256xf32>
    %85 = arith.addf %74, %84 : vector<8x256xf32>
    %cst_28 = arith.constant 5.000000e+00 : f32
    %86 = vector.broadcast %cst_28 : f32 to vector<8x256xf32>
    %87 = arith.addf %74, %86 : vector<8x256xf32>
    %88 = arith.mulf %85, %87 : vector<8x256xf32>
    %cst_29 = arith.constant 6.000000e+00 : f32
    %89 = vector.broadcast %cst_29 : f32 to vector<8x256xf32>
    %90 = arith.addf %74, %89 : vector<8x256xf32>
    %91 = arith.mulf %88, %90 : vector<8x256xf32>
    %cst_30 = arith.constant 7.000000e+00 : f32
    %92 = vector.broadcast %cst_30 : f32 to vector<8x256xf32>
    %93 = arith.addf %74, %92 : vector<8x256xf32>
    %94 = arith.mulf %91, %93 : vector<8x256xf32>
    %95 = math.log %83 : vector<8x256xf32>
    %96 = math.log %94 : vector<8x256xf32>
    %97 = arith.addf %95, %96 : vector<8x256xf32>
    %cst_31 = arith.constant 8.000000e+00 : f32
    %98 = vector.broadcast %cst_31 : f32 to vector<8x256xf32>
    %99 = arith.addf %74, %98 : vector<8x256xf32>
    %100 = math.log %99 : vector<8x256xf32>
    %101 = tpu.reciprocal %99 {approx = true} : vector<8x256xf32> -> vector<8x256xf32>
    %102 = arith.mulf %101, %101 : vector<8x256xf32>
    %cst_32 = arith.constant -5.95238118E-4 : f32
    %103 = vector.broadcast %cst_32 : f32 to vector<8x256xf32>
    %104 = arith.mulf %102, %103 : vector<8x256xf32>
    %cst_33 = arith.constant 7.93650805E-4 : f32
    %105 = vector.broadcast %cst_33 : f32 to vector<8x256xf32>
    %106 = arith.addf %105, %104 : vector<8x256xf32>
    %107 = arith.mulf %102, %106 : vector<8x256xf32>
    %cst_34 = arith.constant -0.00277777785 : f32
    %108 = vector.broadcast %cst_34 : f32 to vector<8x256xf32>
    %109 = arith.addf %108, %107 : vector<8x256xf32>
    %110 = arith.mulf %102, %109 : vector<8x256xf32>
    %cst_35 = arith.constant 0.0833333358 : f32
    %111 = vector.broadcast %cst_35 : f32 to vector<8x256xf32>
    %112 = arith.addf %111, %110 : vector<8x256xf32>
    %113 = arith.mulf %101, %112 : vector<8x256xf32>
    %cst_36 = arith.constant 5.000000e-01 : f32
    %114 = vector.broadcast %cst_36 : f32 to vector<8x256xf32>
    %115 = arith.subf %99, %114 : vector<8x256xf32>
    %116 = arith.mulf %115, %100 : vector<8x256xf32>
    %117 = arith.subf %116, %99 : vector<8x256xf32>
    %cst_37 = arith.constant 0.918938517 : f32
    %118 = vector.broadcast %cst_37 : f32 to vector<8x256xf32>
    %119 = arith.addf %117, %118 : vector<8x256xf32>
    %120 = arith.addf %119, %113 : vector<8x256xf32>
    %121 = arith.subf %120, %97 : vector<8x256xf32>
    %cst_38 = arith.constant dense<0.000000e+00> : vector<8xf32>
    %122 = vector.multi_reduction <add>, %121, %cst_38 [1] : vector<8x256xf32> to vector<8xf32>
    %123 = vector.shape_cast %122 : vector<8xf32> to vector<8x1xf32>
    %124 = arith.subf %72, %123 : vector<8x1xf32>
    %c1_i32 = arith.constant 1 : i32
    %125 = arith.muli %arg0, %c1_i32 : i32
    %126 = arith.addi %125, %arg1 : i32
    %c8_i32 = arith.constant 8 : i32
    %127 = arith.muli %126, %c8_i32 : i32
    %128 = tpu.iota {dimensions = array<i32: 0>} : vector<8x1xi32>
    %129 = vector.broadcast %127 : i32 to vector<8x1xi32>
    %130 = arith.addi %129, %128 : vector<8x1xi32>
    %c16_i32 = arith.constant 16 : i32
    %131 = vector.broadcast %c16_i32 : i32 to vector<8x1xi32>
    %132 = arith.cmpi slt, %130, %131 : vector<8x1xi32>
    %cst_39 = arith.constant 0.000000e+00 : f32
    %133 = vector.broadcast %cst_39 : f32 to vector<8x1xf32>
    %134 = arith.select %132, %124, %133 : vector<8x1xi1>, vector<8x1xf32>
    %c0_40 = arith.constant 0 : index
    %c0_41 = arith.constant 0 : index
    %135 = vector.load %arg5[%c0_40, %c0_41] : memref<8x1xf32, #tpu.memory_space<vmem>>, vector<8x1xf32>
    %136 = arith.addf %135, %134 : vector<8x1xf32>
    %c0_42 = arith.constant 0 : index
    %c0_43 = arith.constant 0 : index
    %137 = vector.load %arg5[%c0_42, %c0_43] : memref<8x1xf32, #tpu.memory_space<vmem>>, vector<8x1xf32>
    tpu.vector_store %arg5[%c0_42, %c0_43], %136 {strides = array<i32>} : memref<8x1xf32, #tpu.memory_space<vmem>>, vector<8x1xf32>,
    %c0_i32_44 = arith.constant 0 : i32
    %138 = arith.cmpi eq, %arg1, %c0_i32_44 : i32
    %139 = arith.extui %138 : i1 to i32
    %c0_i32_45 = arith.constant 0 : i32
    %140 = arith.cmpi ne, %139, %c0_i32_45 : i32
    scf.if %140 {
      %c0_46 = arith.constant 0 : index
      %c0_47 = arith.constant 0 : index
      %141 = vector.load %arg5[%c0_46, %c0_47] : memref<8x1xf32, #tpu.memory_space<vmem>>, vector<8x1xf32>
      %142 = vector.shape_cast %141 : vector<8x1xf32> to vector<1x8x1xf32>
      %cst_48 = arith.constant dense<0.000000e+00> : vector<1xf32>
      %143 = vector.multi_reduction <add>, %142, %cst_48 [1, 2] : vector<1x8x1xf32> to vector<1xf32>
      %144 = vector.shape_cast %143 : vector<1xf32> to vector<1x1x1xf32>
      %145 = vector.extract %144[0, 0, 0] : f32 from vector<1x1x1xf32>
      %146 = vector.broadcast %145 : f32 to vector<1x1x1xf32>
      %c0_49 = arith.constant 0 : index
      %c0_50 = arith.constant 0 : index
      %c0_51 = arith.constant 0 : index
      %147 = vector.load %arg4[%c0_49, %c0_50, %c0_51] : memref<1x1x1xf32, #tpu.memory_space<vmem>>, vector<1x1x1xf32>
      tpu.vector_store %arg4[%c0_49, %c0_50, %c0_51], %146 {strides = array<i32>} : memref<1x1x1xf32, #tpu.memory_space<vmem>>, vector<1x1x1xf32>,
    } else {
    }
    return
  }
  func.func @transform_0(%arg0: i32, %arg1: i32) -> (i32, i32) {
    %c1_i32 = arith.constant 1 : i32
    %0 = arith.muli %arg0, %c1_i32 : i32
    %1 = arith.addi %0, %arg1 : i32
    %c0_i32 = arith.constant 0 : i32
    %c0_i32_0 = arith.constant 0 : i32
    return %1, %c0_i32 : i32, i32
  }
  func.func @transform_1(%arg0: i32, %arg1: i32) -> (i32, i32) {
    %c1_i32 = arith.constant 1 : i32
    %0 = arith.muli %arg0, %c1_i32 : i32
    %1 = arith.addi %0, %arg1 : i32
    %c0_i32 = arith.constant 0 : i32
    %c0_i32_0 = arith.constant 0 : i32
    return %1, %c0_i32 : i32, i32
  }
  func.func @transform_2(%arg0: i32, %arg1: i32) -> (i32, i32, i32) {
    %c0_i32 = arith.constant 0 : i32
    %c0_i32_0 = arith.constant 0 : i32
    %c0_i32_1 = arith.constant 0 : i32
    return %arg0, %c0_i32, %c0_i32_0 : i32, i32, i32
  }
}

</mosaic_0001>

<bundles_post_ra>
// kernel: tpu_custom_call.1
= control target key start
LH: loop header
LB: loop body
LE: loop exit
PB: predicated region body
PF: predicated region fallthrough
CT: control target
= control target key end

     0   :  { %7 = vsyncpa [#allocation4], 0  ;;  %s951_s0 = inlined_call_operand.hbm [shape: f32[16,256], index: 0, kind: input, shape index: {}]   ;;  %s952_s1 = inlined_call_operand.hbm [shape: f32[16,256], index: 1, kind: input, shape index: {}]   ;;  %s953_s2 = inlined_call_operand.vmem [shape: f32[2,1,1], index: 2, kind: output, shape index: {}]  }
   0x1   :  { %9 = vsyncpa [#allocation4 + $0x1], 0 }
   0x2   :  { %10 = vsyncpa [#allocation6], 0 }
   0x3   :  { %12 = vsyncpa [#allocation6 + $0x1], 0  ;;  %s738_s9 = smov 0   ;;  %s740_s10 = smov 0  }
   0x4   :  { %s742_s11 = smov 0   ;;  %s744_s12 = smov 0  }
   0x5   :  { %s746_s13 = smov 0   ;;  %s748_s14 = smov 0  }
   0x6 LB: > { %s490_s15 = sadd.s32 4294967295, %s718_s14   ;;  %s30_s16 = sadd.s32 1, %s714_s13  ;;  %s718_s14 = sphi %s748_s14, %s18_s14   ;;  %s714_s13 = sphi %s746_s13, %s967_s13   ;;  %s710_s12 = sphi %s744_s12, %s966_s12   ;;  %s706_s11 = sphi %s742_s11, %s965_s11   ;;  %s702_s10 = sphi %s740_s10, %s964_s10   ;;  %s698_s9 = sphi %s738_s9, %s963_s9  }
   0x7   : > { %p32_p0 = scmp.ge.s32.totalorder %s30_s16, 2  ;;  %s39_s17 = sadd.s32 1, %s706_s11 }
   0x8   : > { %p46_p1 = scmp.ne.s32.totalorder %s706_s11, %s702_s10  ;;  %p47_p2 = scmp.eq.s32.totalorder %s718_s14, 0 }
   0x9   : > { %s969_s16 = smov (%p32_p0, %s30_s16), 0  ;;  %p52_p4 = scmp.ne.s32.totalorder %s702_s10, %s698_s9 }
   0xa   : > { %p774_p3 = por %p47_p2, %p46_p1  ;;  %s36_s19 = ssub.s32 %s714_s13, %s969_s16 }
   0xb   : > { %p53_p5 = scmp.eq.s32.totalorder %s490_s15, 0  ;;  %p37_p6 = scmp.eq.s32.totalorder %s36_s19, 0 }
   0xc   : > { %p524_p8 = scmp.lt.s32.totalorder %s718_s14, 2  ;;  %s790_s22 = sand.u32 1, %s706_s11  }
   0xd   : > { %p781_p7 = por %p53_p5, %p52_p4  ;;  %s509_s23 = sshll.u32 %s714_s13, 8 }
   0xe   : > { %s787_s21 = scalar_select %p37_p6, %s706_s11, %s39_s17  }
   0xf   : > { %s956_s20 = scalar_select %p781_p7, 1, 0 }
  0x10   : > { %s494_s24 = sshll.u32 %s790_s22, 4  ;;  %s799_s27 = scalar_lea.hbm %s951_s0, %s509_s23 }
  0x11   : > { %s134_s28 = scalar_lea.vmem [#allocation3], %s494_s24  ;;  %p805_p9 = pnand %p524_p8, %p774_p3 }
  0x12   : > { %s143_s29 = sshll.u32 %s134_s28, 4  ;;  %s131_s3 = scalar_lea.sflag [#allocation4], %s790_s22  ;;  %s809_s29 = int_to_ptr.vmem [resolvable:$true] %s143_s29 }
  0x13   : > { %s604_s4 = scalar_lea.hbm %s799_s27, 256  ;;  %p606_p13 = pneg %p805_p9 }
  0x14   : > { %p605_p12 = scmp.ne.s32.totalorder %s799_s27, %s604_s4  ;;  %s609_s7 = scalar_lea.hbm %s951_s0, 512 }
  0x15   : > { %p610_p2 = scmp.lt.u32.totalorder %s799_s27, %s951_s0  ;;  %p611_p3 = scmp.lt.u32.totalorder %s609_s7, %s604_s4 }
  0x16   : > { %p607_p0 = pnand %p606_p13, %p605_p12  ;;  %p613_p5 = scmp.lt.u32.totalorder %s604_s4, %s799_s27 }
  0x17   : > { %p612_p4 = por %p611_p3, %p610_p2 }
  0x18   : > { %p608_p1 = pneg %p607_p0 }
  0x19   : > { %p614_p6 = por %p613_p5, %p612_p4 }
  0x1b   : > { %p615_p8 = pnand %p614_p6, %p608_p1 }
  0x1d   : > { %618 = shalt.err (!%p615_p8)
}
  0x1e   : > { %s619_s15 = scalar_lea.vmem %s809_s29, 256  ;;  %s720_s17 = smov [#allocation3]  }
  0x1f   : > { %p620_p12 = scmp.ne.s32.totalorder %s809_s29, %s619_s15  ;;  %s624_s18 = sshll.u32 %s720_s17, 4  ;;  %s625_s18 = int_to_ptr.vmem [resolvable:$false] %s624_s18 }
  0x20   : > { %s626_s19 = scalar_lea.vmem %s625_s18, 512  ;;  %p627_p11 = scmp.lt.s32.totalorder %s809_s29, %s625_s18 }
  0x21   : > { %p622_p0 = pnand %p620_p12, %p606_p13  ;;  %p628_p2 = scmp.lt.s32.totalorder %s626_s19, %s619_s15 }
  0x23   : > { %p623_p10 = pneg %p622_p0  ;;  %p629_p3 = por %p628_p2, %p627_p11 }
  0x25   : > { %p630_p4 = pnand %p629_p3, %p623_p10 }
  0x27   : > { %633 = shalt.err (!%p630_p4)
}
  0x28   : > { %520 = dma.hbm_to_vmem [thread:$0]  (!%p805_p9), %s799_s27, 256, %s809_s29, %s131_s3  }
  0x29   : > { %p958_p1 = scmp.lt.s32.totalorder %s718_s14, 3  ;;  %p959_p5 = scmp.ge.s32.totalorder %s718_s14, 1 }
  0x2a   : > { %s852_s4 = scalar_lea.hbm %s952_s1, %s509_s23  ;;  %s154_s5 = scalar_lea.vmem [#allocation5], %s494_s24 }
  0x2b   : > { %p843_p6 = pnand %p959_p5, %p958_p1  ;;  %s163_s6 = sshll.u32 %s154_s5, 4  ;;  %s164_s6 = int_to_ptr.vmem [resolvable:$true] %s163_s6 }
  0x2c   : > { %s151_s27 = scalar_lea.sflag [#allocation6], %s790_s22  ;;  %s634_s29 = scalar_lea.hbm %s852_s4, 256 }
  0x2d   : > { %s960_s25 = scalar_select %p843_p6, 1, 0 }
  0x2e   : > { %p635_p10 = scmp.ne.s32.totalorder %s852_s4, %s634_s29  ;;  %s639_s23 = scalar_lea.hbm %s952_s1, 512 }
  0x2f   : > { %p640_p12 = scmp.lt.u32.totalorder %s852_s4, %s952_s1  ;;  %p641_p0 = scmp.lt.u32.totalorder %s639_s23, %s634_s29 }
  0x30   : > { %p637_p11 = pnand %p635_p10, %p606_p13  ;;  %p643_p3 = scmp.lt.u32.totalorder %s634_s29, %s852_s4 }
  0x31   : > { %p642_p2 = por %p641_p0, %p640_p12 }
  0x32   : > { %p638_p8 = pneg %p637_p11 }
  0x33   : > { %p644_p4 = por %p643_p3, %p642_p2 }
  0x35   : > { %p645_p1 = pnand %p644_p4, %p638_p8 }
  0x37   : > { %648 = shalt.err (!%p645_p1)
}
  0x38   : > { %s649_s22 = scalar_lea.vmem %s164_s6, 256  ;;  %s721_s24 = smov [#allocation5]  }
  0x39   : > { %p650_p5 = scmp.ne.s32.totalorder %s164_s6, %s649_s22  ;;  %s654_s15 = sshll.u32 %s721_s24, 4  ;;  %s655_s15 = int_to_ptr.vmem [resolvable:$false] %s654_s15 }
  0x3a   : > { %s656_s17 = scalar_lea.vmem %s655_s15, 512  ;;  %p657_p7 = scmp.lt.s32.totalorder %s164_s6, %s655_s15 }
  0x3b   : > { %p652_p10 = pnand %p650_p5, %p606_p13  ;;  %p658_p6 = scmp.lt.s32.totalorder %s656_s17, %s649_s22 }
  0x3d   : > { %p653_p11 = pneg %p652_p10  ;;  %p659_p0 = por %p658_p6, %p657_p7 }
  0x3f   : > { %p660_p12 = pnand %p659_p0, %p653_p11 }
  0x41   : > { %663 = shalt.err (!%p660_p12)
}
  0x42   : > { %523 = dma.hbm_to_vmem [thread:$0]  (!%p805_p9), %s852_s4, 256, %s164_s6, %s151_s27  }
  0x43   : > { %p961_p8 = scmp.ne.s32.totalorder %s960_s25, 0 }
  0x44   : > { %s174_s18 = sand.u32 (!%p961_p8), 1, %s702_s10   ;;  %p962_p13 = scmp.ne.s32.totalorder (!%p961_p8), %s956_s20, 0 }
  0x45   : > { %172 = sbr.rel (%p961_p8) target bundleno = 769 (0x301), region = 28  ;;  %s501_s19 = sshll.u32 (!%p961_p8), %s174_s18, 4 }
  0x46   : > { %s175_s26 = scalar_lea.sflag (!%p961_p8), [#allocation4], %s174_s18  ;;  %s178_s28 = scalar_lea.vmem (!%p961_p8), [#allocation3], %s501_s19 }
  0x4c   : > { %689 = dma.done.wait (%p962_p13), %s175_s26, 256  }
  0x4d   : > { %691 = vsyncadd (%p962_p13), %s175_s26, 4294967040  ;;  %s184_s5 = scalar_lea.sflag [#allocation6], %s174_s18  ;;  %s187_s29 = scalar_lea.vmem [#allocation5], %s501_s19 }
  0x4e   : > { %693 = dma.done.wait (%p962_p13), %s184_s5, 256  }
  0x4f   : > { %695 = vsyncadd (%p962_p13), %s184_s5, 4294967040  ;;  %v887_v0 = vld [vmem:[%s178_s28] sm:$0xff]  ;;  %v889_v1 = vld [vmem:[%s178_s28 + $0x8] sm:$0xff]  ;;  %vm220_vm0 = vcmask 7168   ;;  %s506_s20 = sshll.u32 %s710_s12, 3  ;;  %p213_p7 = scmp.lt.s32.totalorder %s710_s12, 1 }
  0x50   : > { %v228_v2 = vmax.f32 %v887_v0, %v889_v1  ;;  %v224_v3 = vld [vmem:[%s187_s29] sm:$0xff]  ;;  %v225_v4 = vld [vmem:[%s187_s29 + $0x8] sm:$0xff]  ;;  %vm396_vm2 = vcmask 0  }
  0x51   : > { %v893_v5 = vmax.f32 %v224_v3, 1e-08  ;;  %v895_v6 = vmax.f32 %v225_v4, 1e-08  ;;  %s971_s12 = smov (!%p213_p7, %s710_s12), 1 }
  0x52   : > { %229 = vmax.xlane.f32.xlu0 %v228_v2  ;;  %s215_s4 = scalar_lea.vmem %s953_s2, %s971_s12 }
  0x53   : > { %v250_v7 = vadd.f32 %v895_v6, %v893_v5  ;;  %v291_v16 = vadd.f32 1.0, %v893_v5  ;;  %v292_v17 = vadd.f32 1.0, %v895_v6 }
  0x55   : > { %251 = vadd.xlane.f32.xlu1 %v250_v7  ;;  %v907_v18 = vadd.f32 8.0, %v291_v16  ;;  %v909_v19 = vadd.f32 8.0, %v292_v17  ;;  %v293_v20 = vadd.f32 1.0, %v291_v16  ;;  %v294_v21 = vadd.f32 1.0, %v292_v17 }
  0x56   : > { %v305_v22 = vadd.f32 4.0, %v291_v16  ;;  %v306_v23 = vadd.f32 4.0, %v292_v17  ;;  %v307_v24 = vadd.f32 5.0, %v291_v16  ;;  %v308_v25 = vadd.f32 5.0, %v292_v17 }
  0x57   : > { %v295_v26 = vmul.f32 %v293_v20, %v291_v16  ;;  %v296_v27 = vmul.f32 %v294_v21, %v292_v17  ;;  %v297_v28 = vadd.f32 2.0, %v291_v16  ;;  %v298_v29 = vadd.f32 2.0, %v292_v17 }
  0x58   : > { %v309_v30 = vmul.f32 %v307_v24, %v305_v22  ;;  %v310_v31 = vmul.f32 %v308_v25, %v306_v23  ;;  %v311_v32 = vadd.f32 6.0, %v291_v16  ;;  %v312_v33 = vadd.f32 6.0, %v292_v17 }
  0x59   : > { %v299_v35 = vmul.f32 %v297_v28, %v295_v26  ;;  %v300_v36 = vmul.f32 %v298_v29, %v296_v27  ;;  %v301_v37 = vadd.f32 3.0, %v291_v16  ;;  %v302_v38 = vadd.f32 3.0, %v292_v17 }
  0x5a   : > { %v313_v40 = vmul.f32 %v311_v32, %v309_v30  ;;  %v314_v41 = vmul.f32 %v312_v33, %v310_v31  ;;  %v315_v42 = vadd.f32 7.0, %v291_v16  ;;  %v316_v43 = vadd.f32 7.0, %v292_v17 }
  0x5b   : > { %v303_v44 = vmul.f32 %v301_v37, %v299_v35  ;;  %v304_v45 = vmul.f32 %v302_v38, %v300_v36  ;;  %v504_v58 = vadd.f32 -0.5, %v907_v18  ;;  %v505_v61 = vadd.f32 -0.5, %v909_v19 }
  0x5c   : > { %v317_v47 = vmul.f32 %v315_v42, %v313_v40  ;;  %v318_v48 = vmul.f32 %v316_v43, %v314_v41  ;;  %v722_v41 = vmov 0.0  }
  0x5d   : > { %221 = vst.msk [vmem:[#allocation2] sm:$0xff] %vm220_vm0, %v722_v41 }
  0xdf   : > { %v899_v8 = vpop.xlane.xlu0 %229 }
  0xe0   : > { %v231_v9 = vsub.f32 %v887_v0, %v899_v8  ;;  %v232_v10 = vsub.f32 %v889_v1, %v899_v8 }
  0xe2   : > { %v233_v11 = vmul.f32 1.442695, %v231_v9  ;;  %v235_v12 = vmul.f32 1.442695, %v232_v10  ;;  %v252_v42 = vpop.xlane.xlu1 %251 }
  0xe3   : > { %v253_v43 = vadd.f32 1.0, %v252_v42 }
  0xe4   : > { %574 = vpow2.f32 %v233_v11 }
  0xe5   : > { %576 = vpow2.f32 %v235_v12 }
  0xe6   : > { %578 = vrcp.f32 %v907_v18 }
  0xe7   : > { %580 = vrcp.f32 %v909_v19 }
  0xe8   : > { %582 = vlog2.f32 %v907_v18 }
  0xe9   : > { %584 = vlog2.f32 %v909_v19 }
  0xea   : > { %586 = vlog2.f32 %v303_v44  ;;  %v272_v44 = vadd.f32 8.0, %v253_v43 }
  0xeb   : > { %588 = vlog2.f32 %v304_v45 }
  0xec   : > { %590 = vlog2.f32 %v317_v47 }
  0xed   : > { %592 = vlog2.f32 %v318_v48  ;;  %v256_v48 = vadd.f32 2.0, %v253_v43 }
  0xee   : > { %v575_v13 = vpop.eup %574 }
  0xef   : > { %v577_v14 = vpop.eup %576 }
  0xf0   : > { %v237_v15 = vadd.f32 %v577_v14, %v575_v13  ;;  %v579_v34 = vpop.eup %578 }
  0xf1   : > { %v581_v39 = vpop.eup %580  ;;  %v337_v46 = vmul.f32 %v579_v34, %v579_v34 }
  0xf2   : > { %238 = vadd.xlane.f32.xlu0 %v237_v15  ;;  %v338_v49 = vmul.f32 %v581_v39, %v581_v39  ;;  %v583_v59 = vpop.eup %582 }
  0xf3   : > { %v339_v50 = vmul.f32 -0.0005952381, %v337_v46  ;;  %v585_v62 = vpop.eup %584  ;;  %v332_v63 = vmul.f32 0.6931472, %v583_v59 }
  0xf4   : > { %v340_v51 = vmul.f32 -0.0005952381, %v338_v49  ;;  %v587_v3 = vpop.eup %586  ;;  %v334_v4 = vmul.f32 0.6931472, %v585_v62 }
  0xf5   : > { %v341_v52 = vadd.f32 0.0007936508, %v339_v50  ;;  %v589_v9 = vpop.eup %588  ;;  %v320_v10 = vmul.f32 0.6931472, %v587_v3  ;;  %v355_v12 = vmul.f32 %v504_v58, %v332_v63 }
  0xf6   : > { %v342_v53 = vadd.f32 0.0007936508, %v340_v51  ;;  %v591_v13 = vpop.eup %590  ;;  %v322_v14 = vmul.f32 0.6931472, %v589_v9  ;;  %v356_v15 = vmul.f32 %v505_v61, %v334_v4  ;;  %v258_v51 = vadd.f32 3.0, %v253_v43 }
  0xf7   : > { %v343_v54 = vmul.f32 %v341_v52, %v337_v46  ;;  %v593_v16 = vpop.eup %592  ;;  %v324_v17 = vmul.f32 0.6931472, %v591_v13  ;;  %v357_v21 = vsub.f32 %v355_v12, %v907_v18  ;;  %v503_v61 = vadd.f32 -0.5, %v272_v44 }
  0xf8   : > { %v344_v55 = vmul.f32 %v342_v53, %v338_v49  ;;  %v326_v22 = vmul.f32 0.6931472, %v593_v16  ;;  %v358_v24 = vsub.f32 %v356_v15, %v909_v19  ;;  %v265_v53 = vadd.f32 7.0, %v253_v43 }
  0xf9   : > { %v345_v56 = vadd.f32 -0.0027777778, %v343_v54  ;;  %v327_v25 = vadd.f32 %v324_v17, %v320_v10  ;;  %v359_v26 = vadd.f32 0.9189385, %v357_v21  ;;  %v371_v9 = vlaneseq }
  0xfa   : > { %v346_v57 = vadd.f32 -0.0027777778, %v344_v55  ;;  %v328_v27 = vadd.f32 %v326_v22, %v322_v14  ;;  %v360_v28 = vadd.f32 0.9189385, %v358_v24  ;;  %v373_v17 = vstv %s506_s20 }
  0xfb   : > { %v347_v60 = vmul.f32 %v345_v56, %v337_v46  ;;  %v260_v46 = vadd.f32 4.0, %v253_v43  ;;  %v372_v14 = vshrl.u32 %v371_v9, 7 }
  0xfc   : > { %v348_v2 = vmul.f32 %v346_v57, %v338_v49  ;;  %v263_v49 = vadd.f32 6.0, %v253_v43 }
  0xfd   : > { %v349_v7 = vadd.f32 0.083333336, %v347_v60 }
  0xfe   : > { %v350_v11 = vadd.f32 0.083333336, %v348_v2 }
  0xff   : > { %v351_v20 = vmul.f32 %v579_v34, %v349_v7 }
 0x100   : > { %v352_v23 = vmul.f32 %v581_v39, %v350_v11 }
 0x101   : > { %v361_v29 = vadd.f32 %v359_v26, %v351_v20  ;;  %v374_v20 = vadd.s32 %v373_v17, %v372_v14  ;;  %v377_v26 = vld [vmem:[#allocation2] sm:$0xff] }
 0x102   : > { %v362_v30 = vadd.f32 %v360_v28, %v352_v23 }
 0x103   : > { %v363_v31 = vsub.f32 %v361_v29, %v327_v25  ;;  %vm375_vm1 = vcmp.lt.s32.totalorder %v374_v20, 16 }
 0x104   : > { %v364_v32 = vsub.f32 %v362_v30, %v328_v27 }
 0x106   : > { %v365_v33 = vadd.f32 %v364_v32, %v363_v31 }
 0x108   : > { %366 = vadd.xlane.f32.xlu0 %v365_v33 }
 0x17f   : > { %v239_v35 = vpop.xlane.xlu0 %238 }
 0x180   : > { %594 = vlog2.f32 %v239_v35 }
 0x181   : > { %596 = vrcp.f32 %v272_v44 }
 0x182   : > { %598 = vlog2.f32 %v272_v44 }
 0x18a   : > { %v595_v36 = vpop.eup %594 }
 0x18b   : > { %v241_v34 = vmul.f32 0.6931472, %v595_v36  ;;  %v597_v45 = vpop.eup %596 }
 0x18c   : > { %v276_v47 = vmul.f32 %v597_v45, %v597_v45  ;;  %v599_v58 = vpop.eup %598 }
 0x18d   : > { %v242_v18 = vadd.f32 %v241_v34, %v899_v8  ;;  %v254_v8 = vadd.f32 1.0, %v253_v43  ;;  %v274_v59 = vmul.f32 0.6931472, %v599_v58 }
 0x18f   : > { %v243_v37 = vsub.f32 %v887_v0, %v242_v18  ;;  %v244_v19 = vsub.f32 %v889_v1, %v242_v18  ;;  %v261_v0 = vadd.f32 5.0, %v253_v43  ;;  %v255_v1 = vmul.f32 %v254_v8, %v253_v43 }
 0x190   : > { %v285_v63 = vmul.f32 %v503_v61, %v274_v59 }
 0x191   : > { %v245_v38 = vmul.f32 %v243_v37, %v893_v5  ;;  %v246_v39 = vmul.f32 %v244_v19, %v895_v6  ;;  %v262_v5 = vmul.f32 %v261_v0, %v260_v46  ;;  %v277_v6 = vmul.f32 -0.0005952381, %v276_v47 }
 0x192   : > { %v257_v50 = vmul.f32 %v256_v48, %v255_v1  ;;  %v286_v4 = vsub.f32 %v285_v63, %v272_v44 }
 0x193   : > { %v247_v40 = vadd.f32 %v246_v39, %v245_v38  ;;  %v264_v52 = vmul.f32 %v263_v49, %v262_v5  ;;  %v278_v54 = vadd.f32 0.0007936508, %v277_v6 }
 0x194   : > { %v259_v55 = vmul.f32 %v258_v51, %v257_v50  ;;  %v287_v13 = vadd.f32 0.9189385, %v286_v4 }
 0x195   : > { %248 = vadd.xlane.f32.xlu1 %v247_v40  ;;  %v266_v56 = vmul.f32 %v265_v53, %v264_v52  ;;  %v279_v57 = vmul.f32 %v278_v54, %v276_v47  ;;  %v367_v23 = vpop.xlane.xlu0 %366 }
 0x196   : > { %600 = vlog2.f32 %v259_v55 }
 0x197   : > { %602 = vlog2.f32 %v266_v56  ;;  %v280_v60 = vadd.f32 -0.0027777778, %v279_v57 }
 0x199   : > { %v281_v62 = vmul.f32 %v280_v60, %v276_v47 }
 0x19b   : > { %v282_v3 = vadd.f32 0.083333336, %v281_v62 }
 0x19d   : > { %v283_v12 = vmul.f32 %v597_v45, %v282_v3 }
 0x19f   : > { %v288_v16 = vadd.f32 %v287_v13, %v283_v12 }
 0x1a0   : > { %v601_v2 = vpop.eup %600 }
 0x1a1   : > { %v603_v7 = vpop.eup %602  ;;  %v268_v10 = vmul.f32 0.6931472, %v601_v2 }
 0x1a2   : > { %v270_v11 = vmul.f32 0.6931472, %v603_v7 }
 0x1a4   : > { %v271_v15 = vadd.f32 %v270_v11, %v268_v10 }
 0x1a6   : > { %v289_v21 = vsub.f32 %v288_v16, %v271_v15 }
 0x222   : > { %v249_v22 = vpop.xlane.xlu1 %248 }
 0x223   : > { %v290_v24 = vadd.f32 %v289_v21, %v249_v22 }
 0x225   : > { %v368_v25 = vsub.f32 %v290_v24, %v367_v23 }
 0x227   : > { %v376_v27 = vsel %vm375_vm1, %v368_v25, 0.0 }
 0x228   : > { %v378_v28 = vadd.f32 %v377_v26, %v376_v27 }
 0x22a   : > { %380 = vst.msk [vmem:[#allocation2] sm:$0xff] %vm220_vm0, %v378_v28 }
 0x231   : > { %v384_v29 = vld [vmem:[#allocation2] sm:$0xff] }
 0x232   : > { %v385_v30 = vsel %vm220_vm0, %v384_v29, 0.0 }
 0x233   : > { %386 = vadd.xlane.f32.xlu1 %v385_v30 }
 0x2c0   : > { %v387_v31 = vpop.xlane.xlu1 %386 }
 0x2c1   : > { %v388_v32 = vrot.slane %v387_v31, 4 }
 0x2c3   : > { %v389_v33 = vadd.f32 %v388_v32, %v387_v31 }
 0x2c5   : > { %v390_v35 = vrot.slane %v389_v33, 2 }
 0x2c7   : > { %v391_v36 = vadd.f32 %v390_v35, %v389_v33 }
 0x2c9   : > { %v392_v34 = vrot.slane %v391_v36, 1 }
 0x2cb   : > { %v393_v18 = vadd.f32 %v392_v34, %v391_v36 }
 0x2cd   : > { %511 = vpush %v393_v18 }
 0x2fe   : > { %s512_s6 = spop %511 }
 0x2ff   : > { %v395_v37 = vstv %s512_s6 }
 0x300   : > { %397 = vst.msk [vmem:[%s215_s4] sm:$0x1] %vm396_vm2, %v395_v37 }
 0x301 PF: > { %s18_s14 = sadd.s32 1, %s718_s14   ;;  %s963_s9 = smov %s702_s10 }
 0x302   : > { %p15_p9 = scmp.ge.s32.totalorder %s18_s14, 4   ;;  %s964_s10 = smov %s706_s11 }
 0x303   : > { %s965_s11 = smov %s787_s21  ;;  %s966_s12 = smov %s714_s13 }
 0x304   : > { %s967_s13 = smov %s969_s16  ;;  %17 = sbr.rel (!%p15_p9) target bundleno = 6 (0x6), region = 89 }
 0x30b   :  { %415 = vsyncpa [#allocation4], 1 }
 0x30c   :  { %417 = vsyncpa [#allocation4 + $0x1], 1 }
 0x30d   :  { %418 = vsyncpa [#allocation6], 1 }
 0x30e   :  { %420 = vsyncpa [#allocation6 + $0x1], 1 }

</bundles_post_ra>
